<compile_context>
chip_gen: v5e
topology: v5e:2x2
jax: 0.10.0
libtpu: 0.0.40
codegen_flags: <defaults>
</compile_context>

<pallas_src>
import jax
import jax.numpy as jnp
from jax.experimental import pallas as pl
from jax.experimental.pallas import tpu as pltpu


# ----------------------------------------------------------------------------- helpers
def _round_up(x, m):
    return ((x + m - 1) // m) * m


def _pick_tile_m(rows, want):
    """Row-tile size: as large as `want` (multiple of 128), but keep >= 2 row tiles when
    enough rows exist so the 'parallel' row axis can feed both v7x TensorCores."""
    tm = max(128, min(want, _round_up(rows, 128)))
    while tm > 128 and _round_up(rows, tm) // tm < 2:
        tm //= 2
    return tm


def _mosaic_params(block_bytes, semantics):
    """Scoped-VMEM limit sized from the real per-step footprint (double-buffered blocks
    + headroom for compiler-internal scratch) instead of a blanket 48 MiB."""
    limit = min(60 << 20, int(2 * block_bytes) + (8 << 20))
    return pltpu.CompilerParams(dimension_semantics=semantics, vmem_limit_bytes=limit)


# ----------------------------------------------------------------------------- kernels
def _embed_ids_kernel(ids_ref, vocab_hbm, pos_ref, out_ref, gbuf, sem):
    """sequence.dim()==2 path: out[r] = vocab[ids[r]] + pos_rows[r] for one row tile.

    ids live in SMEM (scalar prefetch); the vocab table never enters VMEM wholesale —
    referenced rows are DMA-gathered from HBM into `gbuf`.  No one-hot, no MXU."""
    tile_m, _ = out_ref.shape
    base = pl.program_id(0) * tile_m

    # Issue every row-gather DMA for this tile; they all overlap in flight.
    @pl.loop(0, tile_m)
    def _issue(r):
        tok = ids_ref[base + r]
        pltpu.make_async_copy(vocab_hbm.at[pl.ds(tok, 1), :],
                              gbuf.at[pl.ds(r, 1), :],
                              sem).start()

    # Wait for all of them (every copy has the identical (1, H) shape).
    @pl.loop(0, tile_m)
    def _wait(r):
        pltpu.make_async_copy(vocab_hbm.at[pl.ds(0, 1), :],
                              gbuf.at[pl.ds(0, 1), :],
                              sem).wait()

    # Single lane/sublane-dense store of the whole (tile_m, H) tile.
    out_ref[...] = (gbuf[...] + pos_ref[...]).astype(out_ref.dtype)


def _embed_soft_kernel(seq_ref, vocab_ref, pos_ref, out_ref):
    """sequence.dim()==3 path: out = sequence @ vocab_emb.weight + pos_emb[pos].

    Grid = (row_tiles, vocab_reduction_tiles).  Accumulation happens directly in the
    VMEM-resident f32 output block (its block index is constant along k), so there is
    no scratch accumulator and no finalize copy.  The (tile_m, tile_v) sequence tile is
    cast to bf16 here (not in the wrapper), so the big (rows, V) stream is read from
    HBM exactly once."""
    k = pl.program_id(1)

    @pl.when(k == 0)
    def _():
        out_ref[...] = jnp.zeros_like(out_ref)

    # TODO(synk): bf16 operands (f32 accumulation) deviate slightly from PyTorch's f32
    # matmul; drop the .astype below for bit-faithful (but ~3x more MXU passes) f32.
    out_ref[...] += jnp.dot(seq_ref[...].astype(jnp.bfloat16), vocab_ref[...],
                            preferred_element_type=jnp.float32)

    @pl.when(k == pl.num_programs(1) - 1)
    def _():
        out_ref[...] += pos_ref[...].astype(jnp.float32)


# ----------------------------------------------------------------------------- wrappers
def embedding_forward_ids(seq_ids, pos_ids, vocab_w, pos_w, *, tile_m=128):
    B, S = seq_ids.shape
    V, H = vocab_w.shape
    rows = B * S
    tile_m = _pick_tile_m(rows, tile_m)
    rows_p = _round_up(rows, tile_m)

    ids = seq_ids.reshape(rows).astype(jnp.int32)
    if rows_p != rows:
        ids = jnp.pad(ids, (0, rows_p - rows))

    # Positional rows gathered once in the wrapper (tiny table, trivial XLA gather) and
    # streamed per tile — no positional one-hot / second matmul in the kernel.
    pos_rows = pos_w[pos_ids.reshape(rows)]
    if rows_p != rows:
        pos_rows = jnp.pad(pos_rows, ((0, rows_p - rows), (0, 0)))

    block_bytes = 2 * tile_m * H * 4 + tile_m * H * vocab_w.dtype.itemsize
    out = pl.pallas_call(
        _embed_ids_kernel,
        out_shape=jax.ShapeDtypeStruct((rows_p, H), vocab_w.dtype),
        grid_spec=pltpu.PrefetchScalarGridSpec(
            num_scalar_prefetch=1,                                    # ids -> SMEM
            grid=(rows_p // tile_m,),
            in_specs=[
                pl.BlockSpec(memory_space=pl.ANY),                    # vocab table stays in HBM
                pl.BlockSpec((tile_m, H), lambda i, ids: (i, 0)),     # pre-gathered pos rows
            ],
            out_specs=pl.BlockSpec((tile_m, H), lambda i, ids: (i, 0)),
            scratch_shapes=[
                pltpu.VMEM((tile_m, H), vocab_w.dtype),               # gather landing buffer
                pltpu.SemaphoreType.DMA(()),
            ],
        ),
        compiler_params=_mosaic_params(block_bytes, ("parallel",)),   # row tiles independent
    )(ids, vocab_w, pos_rows)
    return out[:rows].reshape(B, S, H)


def embedding_forward_soft(seq_soft, pos_ids, vocab_w, pos_w, *, tile_m=512, tile_v=512):
    B, S, V = seq_soft.shape
    Vw, H = vocab_w.shape
    assert V == Vw
    rows = B * S
    tile_m = _pick_tile_m(rows, tile_m)
    rows_p = _round_up(rows, tile_m)
    tile_v = max(128, min(tile_v, _round_up(V, 128)))
    v_p = _round_up(V, tile_v)

    # The big (rows, V) stream stays f32 in HBM (reshape is free); bf16 cast happens
    # per tile inside the kernel.  Pads only materialize when shapes require them.
    seq2d = seq_soft.reshape(rows, V)
    if rows_p != rows or v_p != V:
        seq2d = jnp.pad(seq2d, ((0, rows_p - rows), (0, v_p - V)))

    vocab_bf = vocab_w.astype(jnp.bfloat16)            # small; reused across all row tiles
    if v_p != V:
        vocab_bf = jnp.pad(vocab_bf, ((0, v_p - V), (0, 0)))

    pos_rows = pos_w[pos_ids.reshape(rows)]            # (rows, H) f32, one tiny XLA gather
    if rows_p != rows:
        pos_rows = jnp.pad(pos_rows, ((0, rows_p - rows), (0, 0)))

    block_bytes = (tile_m * tile_v * 4                 # seq tile (f32)
                   + tile_v * H * 2                    # vocab tile (bf16)
                   + 2 * tile_m * H * 4)               # pos tile + resident out block (f32)
    out = pl.pallas_call(
        _embed_soft_kernel,
        out_shape=jax.ShapeDtypeStruct((rows_p, H), jnp.float32),
        grid_spec=pltpu.PrefetchScalarGridSpec(
            num_scalar_prefetch=0,
            grid=(rows_p // tile_m, v_p // tile_v),                    # reduction axis last
            in_specs=[
                pl.BlockSpec((tile_m, tile_v), lambda i, k: (i, k)),   # soft-seq tile (f32)
                pl.BlockSpec((tile_v, H), lambda i, k: (k, 0)),        # vocab tile (bf16)
                pl.BlockSpec((tile_m, H), lambda i, k: (i, 0)),        # pre-gathered pos rows
            ],
            out_specs=pl.BlockSpec((tile_m, H), lambda i, k: (i, 0)),  # f32 accumulator block
        ),
        compiler_params=_mosaic_params(block_bytes, ("parallel", "arbitrary")),
    )(seq2d, vocab_bf, pos_rows)
    return out[:rows].reshape(B, S, H)


# ----------------------------------------------------------------------------- main
if __name__ == "__main__":
    # Small, TPU-friendly shapes implied by the module (scaled down, but large enough
    # that B*S spans two 128-row tiles so the 'parallel' row axis exercises megacore).
    B, S = 4, 64
    V, H, L = 512, 128, 64          # vocab_size, hidden_dim, max_seq_len (pos table rows)
    PAD_IDX = 0

    key = jax.random.PRNGKey(0)
    k1, k2, k3, k4 = jax.random.split(key, 4)

    # Deterministic synthetic parameters (module __init__ zero-inits; random here so the
    # computation is non-trivial).  padding_idx row zeroed like nn.Embedding(padding_idx=0).
    vocab_w = 0.02 * jax.random.normal(k1, (V, H), dtype=jnp.float32)
    vocab_w = vocab_w.at[PAD_IDX].set(0.0)
    pos_w = 0.02 * jax.random.normal(k2, (L, H), dtype=jnp.float32)

    # Inputs.
    seq_ids = jax.random.randint(k3, (B, S), 0, V, dtype=jnp.int32)
    pos_ids = jnp.tile(jnp.arange(S, dtype=jnp.int32)[None, :], (B, 1))
    seq_soft = jax.nn.softmax(jax.random.normal(k4, (B, S, V), dtype=jnp.float32), axis=-1)

    # --- 2-D (token id) path: exact DMA row gather ---
    out_ids = jax.block_until_ready(embedding_forward_ids(seq_ids, pos_ids, vocab_w, pos_w))
    ref_ids = vocab_w[seq_ids] + pos_w[pos_ids]
    assert out_ids.shape == (B, S, H) and out_ids.dtype == jnp.float32
    assert jnp.allclose(out_ids, ref_ids, rtol=1e-6, atol=1e-6), "id-path mismatch"

    # --- 3-D (soft / one-hot mixture) path ---
    out_soft = jax.block_until_ready(embedding_forward_soft(seq_soft, pos_ids, vocab_w, pos_w))
    seq_bf = seq_soft.astype(jnp.bfloat16).astype(jnp.float32)
    voc_bf = vocab_w.astype(jnp.bfloat16).astype(jnp.float32)
    ref_soft = jnp.einsum("bsv,vh->bsh", seq_bf, voc_bf) + pos_w[pos_ids]
    assert out_soft.shape == (B, S, H) and out_soft.dtype == jnp.float32
    assert jnp.allclose(out_soft, ref_soft, rtol=1e-2, atol=1e-4), "soft-path mismatch"

    print("KERNEL_OK")
</pallas_src>

<mosaic_0001>
module attributes {stable_mosaic.version = 11 : i64} {
  func.func @_embed_ids_kernel(%arg0: i32, %arg1: memref<256xi32, #tpu.memory_space<smem>>, %arg2: memref<512x128xf32, #tpu.memory_space<any>>, %arg3: memref<128x128xf32, #tpu.memory_space<vmem>>, %arg4: memref<128x128xf32, #tpu.memory_space<vmem>>, %arg5: memref<128x128xf32, #tpu.memory_space<vmem>>, %arg6: memref<!tpu.dma_semaphore, #tpu.memory_space<semaphore_mem>>) attributes {dimension_semantics = [#tpu.dimension_semantics<parallel>], iteration_bounds = array<i64: 2>, scalar_prefetch = 1 : i64, scratch_operands = 2 : i64, tpu.core_type = #tpu.core_type<tc>, window_params = [{}, {transform_indices = @transform_1, window_bounds = array<i64: 128, 128>}, {transform_indices = @transform_2, window_bounds = array<i64: 128, 128>}]} {
    %c128_i32 = arith.constant 128 : i32
    %0 = arith.muli %arg0, %c128_i32 : i32
    %c0_i32 = arith.constant 0 : i32
    %c128_i32_0 = arith.constant 128 : i32
    %1 = arith.addi %c0_i32, %c128_i32_0 : i32
    %c1_i32 = arith.constant 1 : i32
    scf.for %arg7 = %c0_i32 to %1 step %c1_i32  : i32 {
      %c1_i32_10 = arith.constant 1 : i32
      %7 = arith.muli %arg7, %c1_i32_10 : i32
      %c0_i32_11 = arith.constant 0 : i32
      %8 = arith.addi %c0_i32_11, %7 : i32
      %9 = arith.addi %0, %8 : i32
      %10 = arith.index_cast %9 : i32 to index
      %11 = memref.load %arg1[%10] : memref<256xi32, #tpu.memory_space<smem>>
      %c0_i32_12 = arith.constant 0 : i32
      %12 = tpu.memref_slice %arg2[%11, %c0_i32_12] : memref<512x128xf32, #tpu.memory_space<any>> -> memref<1x128xf32, #tpu.memory_space<any>>
      %c0_i32_13 = arith.constant 0 : i32
      %13 = tpu.memref_slice %arg5[%8, %c0_i32_13] : memref<128x128xf32, #tpu.memory_space<vmem>> -> memref<1x128xf32, #tpu.memory_space<vmem>>
      tpu.enqueue_dma source(%12 : memref<1x128xf32, #tpu.memory_space<any>>) target(%13 : memref<1x128xf32, #tpu.memory_space<vmem>>) target_semaphore(%arg6 : memref<!tpu.dma_semaphore, #tpu.memory_space<semaphore_mem>>)
    }
    %c128_i32_1 = arith.constant 128 : i32
    %c0_i32_2 = arith.constant 0 : i32
    %c128_i32_3 = arith.constant 128 : i32
    %2 = arith.addi %c0_i32_2, %c128_i32_3 : i32
    %c1_i32_4 = arith.constant 1 : i32
    scf.for %arg7 = %c0_i32_2 to %2 step %c1_i32_4  : i32 {
      %c0_i32_10 = arith.constant 0 : i32
      %c0_i32_11 = arith.constant 0 : i32
      %7 = tpu.memref_slice %arg2[%c0_i32_10, %c0_i32_11] : memref<512x128xf32, #tpu.memory_space<any>> -> memref<1x128xf32, #tpu.memory_space<any>>
      %c0_i32_12 = arith.constant 0 : i32
      %c0_i32_13 = arith.constant 0 : i32
      %8 = tpu.memref_slice %arg5[%c0_i32_12, %c0_i32_13] : memref<128x128xf32, #tpu.memory_space<vmem>> -> memref<1x128xf32, #tpu.memory_space<vmem>>
      tpu.wait_dma2 semaphore(%arg6 : memref<!tpu.dma_semaphore, #tpu.memory_space<semaphore_mem>>) src(%7 : memref<1x128xf32, #tpu.memory_space<any>>) dst(%8 : memref<1x128xf32, #tpu.memory_space<vmem>>)
    }
    %c0 = arith.constant 0 : index
    %c0_5 = arith.constant 0 : index
    %3 = vector.load %arg5[%c0, %c0_5] : memref<128x128xf32, #tpu.memory_space<vmem>>, vector<128x128xf32>
    %c0_6 = arith.constant 0 : index
    %c0_7 = arith.constant 0 : index
    %4 = vector.load %arg3[%c0_6, %c0_7] : memref<128x128xf32, #tpu.memory_space<vmem>>, vector<128x128xf32>
    %5 = arith.addf %3, %4 : vector<128x128xf32>
    %c0_8 = arith.constant 0 : index
    %c0_9 = arith.constant 0 : index
    %6 = vector.load %arg4[%c0_8, %c0_9] : memref<128x128xf32, #tpu.memory_space<vmem>>, vector<128x128xf32>
    tpu.vector_store %arg4[%c0_8, %c0_9], %5 {strides = array<i32>} : memref<128x128xf32, #tpu.memory_space<vmem>>, vector<128x128xf32>,
    return
  }
  func.func @transform_1(%arg0: i32, %arg1: memref<256xi32, #tpu.memory_space<smem>>) -> (i32, i32) {
    %c0_i32 = arith.constant 0 : i32
    %c0_i32_0 = arith.constant 0 : i32
    return %arg0, %c0_i32 : i32, i32
  }
  func.func @transform_2(%arg0: i32, %arg1: memref<256xi32, #tpu.memory_space<smem>>) -> (i32, i32) {
    %c0_i32 = arith.constant 0 : i32
    %c0_i32_0 = arith.constant 0 : i32
    return %arg0, %c0_i32 : i32, i32
  }
}

</mosaic_0001>

<bundles_post_ra>
// kernel: tpu_custom_call.1
= control target key start
LH: loop header
LB: loop body
LE: loop exit
PB: predicated region body
PF: predicated region fallthrough
CT: control target
= control target key end

     0   :  { %s592_s15 = smov [#allocation5]   ;;  %s808_s0 = inlined_call_operand.hbm [shape: s32[256], index: 0, kind: input, shape index: {}]   ;;  %s809_s1 = inlined_call_operand.hbm [shape: f32[512,128], index: 1, kind: input, shape index: {}]   ;;  %s810_s2 = inlined_call_operand.hbm [shape: f32[256,128], index: 2, kind: input, shape index: {}]   ;;  %s811_s3 = inlined_call_operand.hbm [shape: f32[256,128], index: 3, kind: output, shape index: {}]  }
   0x1   :  { %s9_s14 = sshll.u32 %s808_s0, 4  ;;  %s10_s14 = int_to_ptr.hbm [resolvable:$true] %s9_s14 }
   0x2   :  { %12 = dma.hbm_to_smem %s10_s14, 32, %s592_s15, [#allocation4] }
   0x3   :  { %556 = dma.done.wait [#allocation4], 32 }
   0x4   :  { %557 = vsyncadd [#allocation4], 4294967264 }
   0x5   :  { %15 = sfence }
   0x6   :  { %16 = vsyncpa [#allocation7], 0 }
   0x7   :  { %18 = vsyncpa [#allocation7 + $0x1], 0 }
   0x8   :  { %19 = vsyncpa [#allocation8], 0 }
   0x9   :  { %21 = vsyncpa [#allocation8 + $0x1], 0  ;;  %s621_s16 = smov 0   ;;  %s623_s17 = smov 0  }
   0xa   :  { %s625_s18 = smov 0   ;;  %s627_s19 = smov 0  }
   0xb LB: > { %s642_s0 = sadd.s32 4294967295, %s582_s19   ;;  %s353_s20 = sadd.s32 4294967294, %s582_s19   ;;  %s582_s19 = sphi %s627_s19, %s823_s19   ;;  %s578_s18 = sphi %s625_s18, %s822_s18   ;;  %s574_s17 = sphi %s623_s17, %s821_s17   ;;  %s570_s16 = sphi %s621_s16, %s820_s16  }
   0xc   : > { %s646_s21 = sadd.s32 1, %s582_s19   ;;  %s34_s22 = sadd.s32 1, %s578_s18 }
   0xd   : > { %s31_s23 = ssub.s32 %s582_s19, %s646_s21  ;;  %p41_p0 = scmp.ne.s32.totalorder %s578_s18, %s574_s17 }
   0xe   : > { %p32_p1 = scmp.eq.s32.totalorder %s31_s23, 0  ;;  %p42_p2 = scmp.eq.s32.totalorder %s582_s19, 0 }
   0xf   : > { %p47_p3 = scmp.ne.s32.totalorder %s574_s17, %s570_s16  ;;  %p48_p4 = scmp.eq.s32.totalorder %s642_s0, 0 }
  0x10   : > { %s658_s24 = scalar_select %p32_p1, %s578_s18, %s34_s22  }
  0x11   : > { %p660_p5 = por %p42_p2, %p41_p0  ;;  %p664_p6 = por %p48_p4, %p47_p3 }
  0x12   : > { %p71_p7 = scmp.eq.s32.totalorder %s642_s0, 1  ;;  %p77_p8 = scmp.eq.s32.totalorder %s353_s20, 1 }
  0x13   : > { %p383_p10 = scmp.lt.s32.totalorder %s582_s19, 2  ;;  %s97_s29 = sand.u32 1, %s578_s18  }
  0x14   : > { %p671_p11 = por %p71_p7, %p41_p0  ;;  %p675_p12 = por %p77_p8, %p47_p3 }
  0x15   : > { %s369_s30 = sshll.u32 %s582_s19, 7  ;;  %s356_s4 = sshll.u32 %s97_s29, 7 }
  0x16   : > { %s106_s7 = scalar_lea.hbm %s810_s2, %s369_s30  ;;  %s101_s9 = scalar_lea.vmem [#allocation6], %s356_s4 }
  0x17   : > { %s107_s8 = sshll.u32 %s106_s7, 4  ;;  %s109_s10 = sshll.u32 %s101_s9, 4  ;;  %s108_s8 = int_to_ptr.hbm [resolvable:$true] %s107_s8  ;;  %s110_s10 = int_to_ptr.vmem [resolvable:$true] %s109_s10 }
  0x18   : > { %p686_p13 = pnand %p383_p10, %p660_p5  ;;  %p359_p0 = scmp.ge.s32.totalorder %s582_s19, 1 }
  0x19   : > { %p117_p1 = scmp.lt.s32.totalorder %s582_s19, 3  ;;  %s98_s12 = scalar_lea.sflag [#allocation7], %s97_s29 }
  0x1a   : > { %s450_s13 = sshra.s32 %s108_s8, 4  ;;  %p454_p3 = pneg %p686_p13  ;;  %s451_s13 = int_to_ptr.hbm [resolvable:$true] %s450_s13 }
  0x1b   : > { %s452_s14 = scalar_lea.hbm %s451_s13, 128  ;;  %s457_s22 = scalar_lea.hbm %s810_s2, 256 }
  0x1c   : > { %p453_p2 = scmp.ne.s32.totalorder %s451_s13, %s452_s14  ;;  %p458_p5 = scmp.lt.s32.totalorder %s451_s13, %s810_s2 }
  0x1d   : > { %p459_p8 = scmp.lt.s32.totalorder %s457_s22, %s452_s14 }
  0x1e   : > { %p455_p4 = pnand %p454_p3, %p453_p2 }
  0x1f   : > { %p460_p10 = por %p459_p8, %p458_p5 }
  0x20   : > { %p456_p7 = pneg %p455_p4 }
  0x22   : > { %p461_p9 = pnand %p460_p10, %p456_p7 }
  0x24   : > { %464 = shalt.err (!%p461_p9)
}
  0x25   : > { %s593_s29 = smov 128   ;;  %s594_s30 = smov 8  }
  0x26   : > { %378 = dma.hbm_to_vmem [thread:$0]  (!%p686_p13), %s108_s8, 2048, %s110_s10, %s98_s12, %s593_s29, %s593_s29, %s594_s30  }
  0x27   : > { %p118_p2 = pnand %p359_p0, %p117_p1 }
  0x28   : > { %s707_s4 = sand.u32 (!%p118_p2), 1, %s574_s17  }
  0x29   : > { %121 = sbr.rel (%p118_p2) target bundleno = 112 (0x70), region = 24  ;;  %s360_s5 = sshll.u32 (!%p118_p2), %s707_s4, 7 }
  0x2a   : > { %s124_s6 = scalar_lea.sflag (!%p118_p2), [#allocation7], %s707_s4  ;;  %s711_s7 = scalar_lea.vmem (!%p118_p2), [#allocation6], %s360_s5 }
  0x2e   : > { %559 = dma.done.wait (%p664_p6), %s124_s6, 2048  }
  0x2f   : > { %561 = vsyncadd (%p664_p6), %s124_s6, 4294965248  ;;  %s718_s9 = scalar_lea.vmem [#allocation9], %s360_s5  ;;  %s720_s10 = smov 0  }
  0x30 LB: >> { %s817_s8 = sshll.u32 %s642_s0, 7  ;;  %s159_s13 = scalar_lea.vmem [#allocation2], %s586_s10  ;;  %s586_s10 = sphi %s720_s10, %s155_s10  }
  0x31   : >> { %s156_s11 = sadd.s32 %s586_s10, %s817_s8  ;;  %s169_s26 = sshll.u32 %s159_s13, 4  ;;  %s170_s26 = int_to_ptr.vmem [resolvable:$true] %s169_s26 }
  0x32   : >> { %s157_s12 = sld [smem:[#allocation5 + %s156_s11]]  ;;  %s484_s5 = scalar_lea.hbm %s809_s1, 512 }
  0x38   : >> { %s158_s20 = scalar_lea.hbm %s809_s1, %s157_s12 }
  0x39   : >> { %s167_s22 = sshll.u32 %s158_s20, 4  ;;  %s168_s22 = int_to_ptr.hbm [resolvable:$true] %s167_s22 }
  0x3a   : >> { %s480_s23 = sshra.s32 %s168_s22, 4  ;;  %s481_s23 = int_to_ptr.hbm [resolvable:$true] %s480_s23 }
  0x3b   : >> { %s482_s25 = scalar_lea.hbm %s481_s23, 1  ;;  %p485_p9 = scmp.lt.s32.totalorder %s481_s23, %s809_s1 }
  0x3c   : >> { %p483_p6 = scmp.ne.s32.totalorder %s481_s23, %s482_s25  ;;  %p486_p13 = scmp.lt.s32.totalorder %s484_s5, %s482_s25 }
  0x3e   : >> { %p487_p0 = por %p486_p13, %p485_p9 }
  0x40   : >> { %p488_p1 = pnand %p487_p0, %p483_p6 }
  0x42   : >> { %491 = shalt.err (!%p488_p1)  }
  0x43   : >> { %s492_s11 = sshra.s32 %s170_s26, 4  ;;  %s595_s13 = smov [#allocation2]   ;;  %s493_s11 = int_to_ptr.vmem [resolvable:$true] %s492_s11 }
  0x44   : >> { %s494_s12 = scalar_lea.vmem %s493_s11, 1  ;;  %s496_s14 = scalar_lea.vmem %s595_s13, 128 }
  0x45   : >> { %p495_p3 = scmp.ne.s32.totalorder %s493_s11, %s494_s12  ;;  %p497_p4 = scmp.lt.s32.totalorder %s493_s11, [#allocation2] }
  0x46   : >> { %p498_p7 = scmp.lt.s32.totalorder %s496_s14, %s494_s12 }
  0x48   : >> { %p499_p5 = por %p498_p7, %p497_p4 }
  0x4a   : >> { %p500_p8 = pnand %p499_p5, %p495_p3 }
  0x4c   : >> { %503 = shalt.err (!%p500_p8)  }
  0x4d   : >> { %172 = dma.hbm_to_vmem [thread:$0]  %s168_s22, 16, %s170_s26, [#allocation3] }
  0x4e   : >> { %s155_s10 = sadd.s32 1, %s586_s10  }
  0x4f   : >> { %p152_p10 = scmp.ge.s32.totalorder %s155_s10, 128  }
  0x50   : > { %s588_s8 = smov (%p152_p10), 0  }
  0x51   : > { %154 = sbr.rel (!%p152_p10) target bundleno = 48 (0x30), region = 89 }
  0x56 LB: >> { %562 = dma.done.wait [#allocation3], 16  ;;  %s590_s8 = sphi %s588_s8, %s178_s8  }
  0x57   : >> { %563 = vsyncadd [#allocation3], 4294967280  ;;  %s178_s8 = sadd.s32 1, %s590_s8  }
  0x58   : >> { %p175_p2 = scmp.ge.s32.totalorder %s178_s8, 128  }
  0x59   : > { %v182_v0 = vld [vmem:[#allocation2] sm:$0xff] (%p175_p2)  ;;  %v183_v2 = vld [vmem:[#allocation2 + $0x8] sm:$0xff] (%p175_p2)  ;;  %v184_v5 = vld [vmem:[#allocation2 + $0x10] sm:$0xff] (%p175_p2)  ;;  %s818_s10 = sshll.u32 (%p175_p2), %s642_s0, 7  ;;  %s259_s0 = sshll.u32 (%p175_p2), %s718_s9, 4  ;;  %s260_s0 = int_to_ptr.vmem [resolvable:$true] %s259_s0 }
  0x5a   : > { %177 = sbr.rel (!%p175_p2) target bundleno = 86 (0x56), region = 100  ;;  %v198_v1 = vld [vmem:[%s711_s7] sm:$0xff] (%p175_p2)  ;;  %v199_v4 = vld [vmem:[%s711_s7 + $0x8] sm:$0xff] (%p175_p2)  ;;  %v200_v6 = vld [vmem:[%s711_s7 + $0x10] sm:$0xff] (%p175_p2)  ;;  %s258_s20 = scalar_lea.hbm (%p175_p2), %s811_s3, %s818_s10 }
  0x5b   : > { %v214_v3 = vadd.f32 (%p175_p2), %v198_v1, %v182_v0  ;;  %v215_v7 = vadd.f32 (%p175_p2), %v199_v4, %v183_v2  ;;  %v216_v8 = vadd.f32 (%p175_p2), %v200_v6, %v184_v5  ;;  %v185_v9 = vld [vmem:[#allocation2 + $0x18] sm:$0xff] (%p175_p2)  ;;  %v186_v11 = vld [vmem:[#allocation2 + $0x20] sm:$0xff] (%p175_p2)  ;;  %v187_v14 = vld [vmem:[#allocation2 + $0x28] sm:$0xff] (%p175_p2)  ;;  %s261_s22 = sshll.u32 (%p175_p2), %s258_s20, 4  ;;  %s247_s23 = scalar_lea.sflag (%p175_p2), [#allocation8], %s707_s4  ;;  %s262_s22 = int_to_ptr.hbm [resolvable:$true] %s261_s22 }
  0x5c   : > { %v201_v10 = vld [vmem:[%s711_s7 + $0x18] sm:$0xff] (%p175_p2)  ;;  %v202_v13 = vld [vmem:[%s711_s7 + $0x20] sm:$0xff] (%p175_p2)  ;;  %v203_v15 = vld [vmem:[%s711_s7 + $0x28] sm:$0xff] (%p175_p2)  ;;  %s518_s25 = sshra.s32 (%p175_p2), %s262_s22, 4  ;;  %s524_s5 = scalar_lea.hbm (%p175_p2), %s811_s3, 256  ;;  %s519_s25 = int_to_ptr.hbm [resolvable:$true] %s518_s25 }
  0x5d   : > { %230 = vst [vmem:[%s718_s9] sm:$0xff] (%p175_p2), %v214_v3  ;;  %v217_v12 = vadd.f32 (%p175_p2), %v201_v10, %v185_v9  ;;  %v218_v16 = vadd.f32 (%p175_p2), %v202_v13, %v186_v11  ;;  %v219_v17 = vadd.f32 (%p175_p2), %v203_v15, %v187_v14  ;;  %v188_v18 = vld [vmem:[#allocation2 + $0x30] sm:$0xff] (%p175_p2)  ;;  %v189_v20 = vld [vmem:[#allocation2 + $0x38] sm:$0xff] (%p175_p2)  ;;  %v190_v23 = vld [vmem:[#allocation2 + $0x40] sm:$0xff] (%p175_p2)  ;;  %s520_s29 = scalar_lea.hbm (%p175_p2), %s519_s25, 128  ;;  %p525_p0 = scmp.lt.s32.totalorder (%p175_p2), %s519_s25, %s811_s3 }
  0x5e   : > { %231 = vst [vmem:[%s718_s9 + $0x8] sm:$0xff] (%p175_p2), %v215_v7  ;;  %v204_v19 = vld [vmem:[%s711_s7 + $0x30] sm:$0xff] (%p175_p2)  ;;  %v205_v22 = vld [vmem:[%s711_s7 + $0x38] sm:$0xff] (%p175_p2)  ;;  %v206_v24 = vld [vmem:[%s711_s7 + $0x40] sm:$0xff] (%p175_p2)  ;;  %p521_p6 = scmp.ne.s32.totalorder (%p175_p2), %s519_s25, %s520_s29  ;;  %p526_p1 = scmp.lt.s32.totalorder (%p175_p2), %s524_s5, %s520_s29 }
  0x5f   : > { %232 = vst [vmem:[%s718_s9 + $0x10] sm:$0xff] %v216_v8  ;;  %v220_v21 = vadd.f32 %v204_v19, %v188_v18  ;;  %v221_v25 = vadd.f32 %v205_v22, %v189_v20  ;;  %v191_v26 = vld [vmem:[#allocation2 + $0x48] sm:$0xff]  ;;  %v192_v28 = vld [vmem:[#allocation2 + $0x50] sm:$0xff]  ;;  %v222_v29 = vadd.f32 %v206_v24, %v190_v23  ;;  %v193_v31 = vld [vmem:[#allocation2 + $0x58] sm:$0xff] }
  0x60   : > { %233 = vst [vmem:[%s718_s9 + $0x18] sm:$0xff] %v217_v12  ;;  %v207_v27 = vld [vmem:[%s711_s7 + $0x48] sm:$0xff]  ;;  %v208_v30 = vld [vmem:[%s711_s7 + $0x50] sm:$0xff]  ;;  %v209_v32 = vld [vmem:[%s711_s7 + $0x58] sm:$0xff]  ;;  %p522_p9 = pnand %p521_p6, %p671_p11  ;;  %p527_p3 = por %p526_p1, %p525_p0 }
  0x61   : > { %234 = vst [vmem:[%s718_s9 + $0x20] sm:$0xff] %v218_v16  ;;  %v223_v33 = vadd.f32 %v207_v27, %v191_v26  ;;  %v194_v34 = vld [vmem:[#allocation2 + $0x60] sm:$0xff]  ;;  %v224_v36 = vadd.f32 %v208_v30, %v192_v28  ;;  %v195_v37 = vld [vmem:[#allocation2 + $0x68] sm:$0xff]  ;;  %v225_v39 = vadd.f32 %v209_v32, %v193_v31  ;;  %v196_v40 = vld [vmem:[#allocation2 + $0x70] sm:$0xff] }
  0x62   : > { %235 = vst [vmem:[%s718_s9 + $0x28] sm:$0xff] %v219_v17  ;;  %v210_v35 = vld [vmem:[%s711_s7 + $0x60] sm:$0xff]  ;;  %v211_v38 = vld [vmem:[%s711_s7 + $0x68] sm:$0xff]  ;;  %v212_v41 = vld [vmem:[%s711_s7 + $0x70] sm:$0xff]  ;;  %p523_p13 = pneg %p522_p9 }
  0x63   : > { %236 = vst [vmem:[%s718_s9 + $0x30] sm:$0xff] %v220_v21  ;;  %v226_v42 = vadd.f32 %v210_v35, %v194_v34  ;;  %v197_v43 = vld [vmem:[#allocation2 + $0x78] sm:$0xff]  ;;  %v227_v45 = vadd.f32 %v211_v38, %v195_v37  ;;  %v228_v46 = vadd.f32 %v212_v41, %v196_v40 }
  0x64   : > { %237 = vst [vmem:[%s718_s9 + $0x38] sm:$0xff] %v221_v25  ;;  %v213_v44 = vld [vmem:[%s711_s7 + $0x78] sm:$0xff]  ;;  %p528_p4 = pnand %p527_p3, %p523_p13 }
  0x65   : > { %238 = vst [vmem:[%s718_s9 + $0x40] sm:$0xff] %v222_v29  ;;  %v229_v47 = vadd.f32 %v213_v44, %v197_v43 }
  0x66   : > { %239 = vst [vmem:[%s718_s9 + $0x48] sm:$0xff] %v223_v33 }
  0x67   : > { %240 = vst [vmem:[%s718_s9 + $0x50] sm:$0xff] %v224_v36 }
  0x68   : > { %241 = vst [vmem:[%s718_s9 + $0x58] sm:$0xff] %v225_v39 }
  0x69   : > { %242 = vst [vmem:[%s718_s9 + $0x60] sm:$0xff] %v226_v42 }
  0x6a   : > { %243 = vst [vmem:[%s718_s9 + $0x68] sm:$0xff] %v227_v45 }
  0x6b   : > { %244 = vst [vmem:[%s718_s9 + $0x70] sm:$0xff] %v228_v46 }
  0x6c   : > { %245 = vst [vmem:[%s718_s9 + $0x78] sm:$0xff] %v229_v47 }
  0x6d   : > { %531 = shalt.err (!%p528_p4)
}
  0x6e   : > { %s596_s4 = smov 128   ;;  %s597_s9 = smov 8  }
  0x6f   : > { %373 = dma.vmem_to_hbm [thread:$0]  (%p671_p11), %s260_s0, 2048, %s262_s22, %s247_s23, %s596_s4, %s596_s4, %s597_s9  }
  0x70 PF: > { %s276_s12 = sand.u32 1, %s570_s16   ;;  %p819_p7 = scmp.ge.s32.totalorder %s582_s19, 2 }
  0x71   : > { %s277_s13 = scalar_lea.sflag [#allocation8], %s276_s12 }
  0x72   : > { %p380_p5 = pnand %p819_p7, %p675_p12 }
  0x74   : > { %p381_p8 = pneg %p380_p5 }
  0x76   : > { %565 = dma.done.wait (%p381_p8), %s277_s13, 2048  }
  0x77   : > { %567 = vsyncadd (%p381_p8), %s277_s13, 4294965248  ;;  %p24_p10 = scmp.ge.s32.totalorder %s646_s21, 4   ;;  %s820_s16 = smov %s574_s17 }
  0x78   : > { %s821_s17 = smov %s578_s18  ;;  %s822_s18 = smov %s658_s24 }
  0x79   : > { %s823_s19 = smov %s646_s21  ;;  %26 = sbr.rel (!%p24_p10) target bundleno = 11 (0xb), region = 111 }
  0x7e   :  { %283 = vsyncpa [#allocation7], 1 }
  0x7f   :  { %285 = vsyncpa [#allocation7 + $0x1], 1 }
  0x80   :  { %286 = vsyncpa [#allocation8], 1 }
  0x81   :  { %288 = vsyncpa [#allocation8 + $0x1], 1 }
  0x82   :  { %289 = vsyncmov [#allocation3] }
  0x85   :  { %s290_s19 = vpop.sfrf %289 }
  0x86   :  { %p368_p11 = scmp.ne.s32.totalorder %s290_s19, 0 }
  0x88   :  { %294 = shalt.err (%p368_p11)  }

</bundles_post_ra>
